<compile_context>
chip_gen: v7x
topology: tpu7x:2x2x1
jax: 0.10.0
libtpu: 0.0.40
codegen_flags: <defaults>
</compile_context>

<pallas_src>
import functools
import math

import jax
import jax.numpy as jnp
from jax.experimental import pallas as pl
from jax.experimental.pallas import tpu as pltpu

LANES = 128              # vreg lane width
SUBLANES = 8             # f32 sublane count (accumulator shape)
MAX_BLOCK_ROWS = 2048    # (2048, 128) f32 block = 1 MiB -> 4 MiB double-buffered
NUM_SPLITS = 2           # leading "parallel" axis; shards reduction across TCs (v7x)
MIN_PALLAS_ELEMS = 2048  # below this, plain XLA beats the kernel-launch overhead


def _l1_partial_kernel(p_ref, g_ref, o_ref, *, rows_total, block_rows,
                       blocks_per_split, need_mask):
    c = pl.program_id(0)   # parallel split (TensorCore shard)
    i = pl.program_id(1)   # sequential reduction step within the split

    @pl.when(i == 0)
    def _zero():
        o_ref[...] = jnp.zeros_like(o_ref)

    # Cast to f32 in-VMEM (VPU slot has slack on a mem-bound kernel).
    d = jnp.abs(p_ref[...].astype(jnp.float32) - g_ref[...].astype(jnp.float32))

    if need_mask:
        # Zero out rows past the end of a ragged / duplicated (clamped) block.
        row0 = (c * blocks_per_split + i) * block_rows
        row_ids = row0 + jax.lax.broadcasted_iota(jnp.int32, (block_rows, LANES), 0)
        d = jnp.where(row_ids < rows_total, d, 0.0)

    # VPU-only partial reduce into one vreg-shaped (8, 128) accumulator that
    # stays resident in the output block across the reduction axis. The XLU
    # cross-lane/sublane reduce happens exactly once, in the wrapper.
    partial = d.reshape(block_rows // SUBLANES, SUBLANES, LANES).sum(axis=0)
    o_ref[...] += partial[None, :, :]


def _l1_partial_sums(p2, g2):
    """p2/g2: (rows, 128), same dtype. Returns (NUM_SPLITS, 8, 128) f32 partial sums."""
    rows = p2.shape[0]
    assert rows >= SUBLANES, "wrapper threshold guarantees at least 8 rows"
    block_rows = min(MAX_BLOCK_ROWS, (rows // SUBLANES) * SUBLANES)
    num_blocks = pl.cdiv(rows, block_rows)
    blocks_per_split = pl.cdiv(num_blocks, NUM_SPLITS)
    # Mask only when blocks are ragged or the per-core split is uneven.
    need_mask = (NUM_SPLITS * blocks_per_split * block_rows) != rows

    kernel = functools.partial(
        _l1_partial_kernel,
        rows_total=rows,
        block_rows=block_rows,
        blocks_per_split=blocks_per_split,
        need_mask=need_mask,
    )

    def in_map(c, i):
        # Clamp so an uneven split never issues an out-of-bounds DMA; the
        # duplicated block is fully masked inside the kernel.
        return (jnp.minimum(c * blocks_per_split + i, num_blocks - 1), 0)

    return pl.pallas_call(
        kernel,
        out_shape=jax.ShapeDtypeStruct((NUM_SPLITS, SUBLANES, LANES), jnp.float32),
        grid_spec=pltpu.PrefetchScalarGridSpec(
            num_scalar_prefetch=0,
            grid=(NUM_SPLITS, blocks_per_split),
            in_specs=[
                pl.BlockSpec((block_rows, LANES), in_map),
                pl.BlockSpec((block_rows, LANES), in_map),
            ],
            out_specs=pl.BlockSpec((1, SUBLANES, LANES), lambda c, i: (c, 0, 0)),
        ),
        compiler_params=pltpu.CompilerParams(
            dimension_semantics=("parallel", "arbitrary"),
            vmem_limit_bytes=32 * 1024 * 1024,
        ),
    )(p2, g2)


def supervised_l1_loss(pc_source, pc_target, pred_flow, gt_flow):
    """Mirrors SupervisedL1Loss.forward: mean |pred_flow - gt_flow|."""
    del pc_source, pc_target  # unused by the loss, same as the PyTorch module
    assert pred_flow.shape == gt_flow.shape

    n_elems = math.prod(pred_flow.shape)
    if n_elems == 0:
        # torch L1Loss (mean reduction) over an empty tensor is NaN.
        return jnp.full((), jnp.nan, dtype=jnp.float32)

    p = jnp.reshape(pred_flow, (-1,))
    g = jnp.reshape(gt_flow, (-1,))

    if n_elems < MIN_PALLAS_ELEMS:
        # Tiny inputs: fixed pallas_call overhead dominates; let XLA fuse it.
        return jnp.mean(jnp.abs(p.astype(jnp.float32) - g.astype(jnp.float32)))

    # Lane-align to a (rows, 128) slab in the NATIVE dtype. When numel is a
    # multiple of 128 this is a free reshape (no HBM copy); otherwise we pad at
    # most 127 elements (zero padding contributes |0 - 0| = 0).
    # TODO(synk): a fully copy-free ragged path would split a <128-element tail
    # into the plain-XLA reduction instead of padding.
    rem = n_elems % LANES
    if rem:
        p = jnp.pad(p, (0, LANES - rem))
        g = jnp.pad(g, (0, LANES - rem))
    rows = p.shape[0] // LANES
    p2 = p.reshape(rows, LANES)
    g2 = g.reshape(rows, LANES)

    partials = _l1_partial_sums(p2, g2)   # (NUM_SPLITS, 8, 128) f32
    total = jnp.sum(partials)             # single cross-lane/sublane reduce
    return total / jnp.float32(n_elems)


if __name__ == "__main__":
    key = jax.random.PRNGKey(0)

    test_shapes = [
        (2, 4, 3),       # tiny -> plain-XLA fast path
        (2, 512, 3),     # numel % 128 == 0 -> zero-copy reshape, single block
        (2, 345, 3),     # ragged tail -> minimal lane pad + in-kernel row mask
        (2, 100000, 3),  # multi-block accumulation along the reduction axis
    ]

    for idx, shape in enumerate(test_shapes):
        k = jax.random.fold_in(key, idx)
        k1, k2, k3, k4 = jax.random.split(k, 4)
        pc_source = jax.random.normal(k1, shape, dtype=jnp.float32)
        pc_target = jax.random.normal(k2, shape, dtype=jnp.float32)
        pred_flow = jax.random.normal(k3, shape, dtype=jnp.float32)
        gt_flow = jax.random.normal(k4, shape, dtype=jnp.float32)

        loss = jax.block_until_ready(
            supervised_l1_loss(pc_source, pc_target, pred_flow, gt_flow))

        # Reference check against plain-JAX L1 mean.
        ref = jnp.mean(jnp.abs(pred_flow - gt_flow))
        assert jnp.allclose(loss, ref, rtol=1e-4, atol=1e-6), (shape, loss, ref)

    print("KERNEL_OK")
</pallas_src>

<mosaic_0001>
module attributes {stable_mosaic.version = 11 : i64} {
  func.func @_l1_partial_kernel(%arg0: i32, %arg1: i32, %arg2: memref<24x128xf32, #tpu.memory_space<vmem>>, %arg3: memref<24x128xf32, #tpu.memory_space<vmem>>, %arg4: memref<1x8x128xf32, #tpu.memory_space<vmem>>) attributes {dimension_semantics = [#tpu.dimension_semantics<parallel>, #tpu.dimension_semantics<arbitrary>], iteration_bounds = array<i64: 2, 1>, scalar_prefetch = 0 : i64, scratch_operands = 0 : i64, tpu.core_type = #tpu.core_type<tc>, window_params = [{transform_indices = @transform_0, window_bounds = array<i64: 24, 128>}, {transform_indices = @transform_1, window_bounds = array<i64: 24, 128>}, {transform_indices = @transform_2, window_bounds = array<i64: 1, 8, 128>}]} {
    %c0_i32 = arith.constant 0 : i32
    %0 = arith.cmpi eq, %arg1, %c0_i32 : i32
    %1 = arith.extui %0 : i1 to i32
    %c0_i32_0 = arith.constant 0 : i32
    %2 = arith.cmpi ne, %1, %c0_i32_0 : i32
    scf.if %2 {
      %cst_12 = arith.constant 0.000000e+00 : f32
      %23 = vector.broadcast %cst_12 : f32 to vector<1x8x128xf32>
      %c0_13 = arith.constant 0 : index
      %c0_14 = arith.constant 0 : index
      %c0_15 = arith.constant 0 : index
      %24 = vector.load %arg4[%c0_13, %c0_14, %c0_15] : memref<1x8x128xf32, #tpu.memory_space<vmem>>, vector<1x8x128xf32>
      tpu.vector_store %arg4[%c0_13, %c0_14, %c0_15], %23 {strides = array<i32>} : memref<1x8x128xf32, #tpu.memory_space<vmem>>, vector<1x8x128xf32>,
    } else {
    }
    %c0 = arith.constant 0 : index
    %c0_1 = arith.constant 0 : index
    %3 = vector.load %arg2[%c0, %c0_1] : memref<24x128xf32, #tpu.memory_space<vmem>>, vector<24x128xf32>
    %c0_2 = arith.constant 0 : index
    %c0_3 = arith.constant 0 : index
    %4 = vector.load %arg3[%c0_2, %c0_3] : memref<24x128xf32, #tpu.memory_space<vmem>>, vector<24x128xf32>
    %5 = arith.subf %3, %4 : vector<24x128xf32>
    %6 = math.absf %5 : vector<24x128xf32>
    %c1_i32 = arith.constant 1 : i32
    %7 = arith.muli %arg0, %c1_i32 : i32
    %8 = arith.addi %7, %arg1 : i32
    %c24_i32 = arith.constant 24 : i32
    %9 = arith.muli %8, %c24_i32 : i32
    %10 = tpu.iota {dimensions = array<i32: 0>} : vector<24x128xi32>
    %11 = vector.broadcast %9 : i32 to vector<24x128xi32>
    %12 = arith.addi %11, %10 : vector<24x128xi32>
    %c24_i32_4 = arith.constant 24 : i32
    %13 = vector.broadcast %c24_i32_4 : i32 to vector<24x128xi32>
    %14 = arith.cmpi slt, %12, %13 : vector<24x128xi32>
    %cst = arith.constant 0.000000e+00 : f32
    %15 = vector.broadcast %cst : f32 to vector<24x128xf32>
    %16 = arith.select %14, %6, %15 : vector<24x128xi1>, vector<24x128xf32>
    %17 = vector.shape_cast %16 : vector<24x128xf32> to vector<3x8x128xf32>
    %cst_5 = arith.constant dense<0.000000e+00> : vector<8x128xf32>
    %18 = vector.multi_reduction <add>, %17, %cst_5 [0] : vector<3x8x128xf32> to vector<8x128xf32>
    %c0_6 = arith.constant 0 : index
    %c0_7 = arith.constant 0 : index
    %c0_8 = arith.constant 0 : index
    %19 = vector.load %arg4[%c0_6, %c0_7, %c0_8] : memref<1x8x128xf32, #tpu.memory_space<vmem>>, vector<1x8x128xf32>
    %20 = vector.shape_cast %18 : vector<8x128xf32> to vector<1x8x128xf32>
    %21 = arith.addf %19, %20 : vector<1x8x128xf32>
    %c0_9 = arith.constant 0 : index
    %c0_10 = arith.constant 0 : index
    %c0_11 = arith.constant 0 : index
    %22 = vector.load %arg4[%c0_9, %c0_10, %c0_11] : memref<1x8x128xf32, #tpu.memory_space<vmem>>, vector<1x8x128xf32>
    tpu.vector_store %arg4[%c0_9, %c0_10, %c0_11], %21 {strides = array<i32>} : memref<1x8x128xf32, #tpu.memory_space<vmem>>, vector<1x8x128xf32>,
    return
  }
  func.func @transform_0(%arg0: i32, %arg1: i32) -> (i32, i32) {
    %c1_i32 = arith.constant 1 : i32
    %0 = arith.muli %arg0, %c1_i32 : i32
    %1 = arith.addi %0, %arg1 : i32
    %c0_i32 = arith.constant 0 : i32
    %2 = arith.minsi %1, %c0_i32 : i32
    %c0_i32_0 = arith.constant 0 : i32
    %c0_i32_1 = arith.constant 0 : i32
    return %2, %c0_i32_0 : i32, i32
  }
  func.func @transform_1(%arg0: i32, %arg1: i32) -> (i32, i32) {
    %c1_i32 = arith.constant 1 : i32
    %0 = arith.muli %arg0, %c1_i32 : i32
    %1 = arith.addi %0, %arg1 : i32
    %c0_i32 = arith.constant 0 : i32
    %2 = arith.minsi %1, %c0_i32 : i32
    %c0_i32_0 = arith.constant 0 : i32
    %c0_i32_1 = arith.constant 0 : i32
    return %2, %c0_i32_0 : i32, i32
  }
  func.func @transform_2(%arg0: i32, %arg1: i32) -> (i32, i32, i32) {
    %c0_i32 = arith.constant 0 : i32
    %c0_i32_0 = arith.constant 0 : i32
    %c0_i32_1 = arith.constant 0 : i32
    return %arg0, %c0_i32, %c0_i32_0 : i32, i32, i32
  }
}

</mosaic_0001>

<bundles_post_ra>
// kernel: tpu_custom_call.1
= control target key start
LH: loop header
LB: loop body
LE: loop exit
PB: predicated region body
PF: predicated region fallthrough
CT: control target
= control target key end

     0   :  { %7 = vsyncpa [#allocation3], 0  ;;  %s901_s0 = inlined_call_operand.hbm [shape: f32[24,128], index: 0, kind: input, shape index: {}]   ;;  %s902_s1 = inlined_call_operand.hbm [shape: f32[24,128], index: 1, kind: input, shape index: {}]   ;;  %s903_s2 = inlined_call_operand.hbm [shape: f32[2,8,128], index: 2, kind: output, shape index: {}]  }
   0x1   :  { %9 = vsyncpa [#allocation3 + $0x1], 0 }
   0x2   :  { %10 = vsyncpa [#allocation6], 0 }
   0x3   :  { %12 = vsyncpa [#allocation6 + $0x1], 0 }
   0x4   :  { %13 = vsyncpa [#allocation4], 0 }
   0x5   :  { %15 = vsyncpa [#allocation4 + $0x1], 0  ;;  %s693_s9 = smov 0   ;;  %s695_s10 = smov 0  }
   0x6   :  { %s697_s11 = smov 0   ;;  %s699_s12 = smov 0  }
   0x7   :  { %s701_s13 = smov 0   ;;  %s703_s14 = smov 0  }
   0x8   :  { %s705_s15 = smov 0   ;;  %s707_s16 = smov 0  }
   0x9 LB: > { %s393_s17 = sadd.s32 4294967295, %s671_s16   ;;  %s394_s18 = sadd.s32 4294967294, %s671_s16   ;;  %s671_s16 = sphi %s707_s16, %s21_s16   ;;  %s667_s15 = sphi %s705_s15, %s922_s15   ;;  %s663_s14 = sphi %s703_s14, %s921_s14   ;;  %s659_s13 = sphi %s701_s13, %s891_s13   ;;  %s655_s12 = sphi %s699_s12, %s920_s12   ;;  %s651_s11 = sphi %s697_s11, %s919_s11   ;;  %s647_s10 = sphi %s695_s10, %s918_s10   ;;  %s643_s9 = sphi %s693_s9, %s917_s9  }
   0xa   : > { %s33_s19 = sadd.s32 1, %s667_s15  ;;  %p640_p1 = scmp.ne.s32.totalorder %s659_s13, 0 }
   0xb   : > { %p35_p0 = scmp.ge.s32.totalorder %s33_s19, 2  ;;  %p54_p2 = scmp.eq.s32.totalorder %s671_s16, 0 }
   0xc   : > { %p59_p3 = scmp.ne.s32.totalorder %s659_s13, %s655_s12  ;;  %p60_p5 = scmp.eq.s32.totalorder %s393_s17, 0 }
   0xd   : > { %s924_s19 = smov (%p35_p0, %s33_s19), 0  ;;  %p739_p4 = por %p640_p1, %p54_p2 }
   0xe   : > { %p743_p6 = por %p60_p5, %p59_p3  ;;  %s101_s22 = ssub.s32 %s667_s15, %s924_s19 }
   0xf   : > { %p102_p7 = scmp.eq.s32.totalorder %s101_s22, 0  ;;  %s104_s23 = sadd.s32 1, %s651_s11 }
  0x10   : > { %s907_s21 = scalar_select %p743_p6, 1, 0 }
  0x11   : > { %s751_s24 = scalar_select %p102_p7, %s651_s11, %s104_s23  }
  0x12   : > { %p114_p8 = scmp.ne.s32.totalorder %s651_s11, %s647_s10  ;;  %p115_p9 = scmp.eq.s32.totalorder %s393_s17, 1 }
  0x13   : > { %p120_p10 = scmp.ne.s32.totalorder %s647_s10, %s643_s9  ;;  %p121_p11 = scmp.eq.s32.totalorder %s394_s18, 1 }
  0x14   : > { %p757_p12 = por %p115_p9, %p114_p8  ;;  %p427_p1 = scmp.lt.s32.totalorder %s671_s16, 2 }
  0x15   : > { %p762_p0 = por %p121_p11, %p120_p10  ;;  %s673_s28 = smov [#allocation2]  }
  0x16   : > { %s908_s25 = scalar_select %p757_p12, 1, 0 }
  0x17   : > { %s909_s26 = scalar_select %p762_p0, 1, 0 }
  0x18   : > { %p769_p2 = pnand %p427_p1, %p739_p4  ;;  %s155_s29 = sshll.u32 %s673_s28, 4  ;;  %s156_s29 = int_to_ptr.vmem [resolvable:$true] %s155_s29 }
  0x19   : > { %s504_s4 = scalar_lea.hbm %s901_s0, 384 }
  0x1a   : > { %p505_p3 = scmp.ne.s32.totalorder %s901_s0, %s504_s4  ;;  %p506_p5 = pneg %p769_p2 }
  0x1b   : > { %p511_p8 = scmp.lt.u32.totalorder %s504_s4, %s504_s4  ;;  %p513_p9 = scmp.lt.u32.totalorder %s504_s4, %s901_s0 }
  0x1c   : > { %p507_p4 = pnand %p506_p5, %p505_p3 }
  0x1d   : > { %p514_p10 = por %p513_p9, %p511_p8 }
  0x1e   : > { %p508_p7 = pneg %p507_p4 }
  0x20   : > { %p515_p11 = pnand %p514_p10, %p508_p7 }
  0x22   : > { %518 = shalt.err (!%p515_p11)
}
  0x23   : > { %s519_s12 = scalar_lea.vmem %s156_s29, 384  ;;  %s526_s17 = scalar_lea.vmem %s156_s29, 768 }
  0x24   : > { %p520_p1 = scmp.ne.s32.totalorder %s156_s29, %s519_s12  ;;  %p527_p12 = scmp.lt.s32.totalorder %s156_s29, %s156_s29 }
  0x25   : > { %p528_p6 = scmp.lt.s32.totalorder %s526_s17, %s519_s12 }
  0x26   : > { %p522_p13 = pnand %p520_p1, %p506_p5 }
  0x27   : > { %p529_p3 = por %p528_p6, %p527_p12 }
  0x28   : > { %p523_p0 = pneg %p522_p13 }
  0x2a   : > { %p530_p4 = pnand %p529_p3, %p523_p0 }
  0x2c   : > { %533 = shalt.err (!%p530_p4)
}
  0x2d   : > { %s674_s18 = smov 128   ;;  %s675_s20 = smov 8  }
  0x2e   : > { %419 = dma.hbm_to_vmem [thread:$0]  (!%p769_p2), %s901_s0, 384, %s156_s29, [#allocation3], %s674_s18, %s674_s18, %s675_s20  }
  0x2f   : > { %p399_p13 = scmp.ge.s32.totalorder %s671_s16, 1  ;;  %p187_p7 = scmp.lt.s32.totalorder %s671_s16, 3 }
  0x30   : > { %s676_s30 = smov [#allocation5]   ;;  %s534_s6 = scalar_lea.hbm %s902_s1, 384 }
  0x31   : > { %p800_p8 = pnand %p399_p13, %p187_p7  ;;  %s179_s3 = sshll.u32 %s676_s30, 4  ;;  %s180_s3 = int_to_ptr.vmem [resolvable:$true] %s179_s3 }
  0x32   : > { %p535_p6 = scmp.ne.s32.totalorder %s902_s1, %s534_s6  ;;  %p541_p9 = scmp.lt.u32.totalorder %s534_s6, %s534_s6 }
  0x33   : > { %s911_s28 = scalar_select %p800_p8, 1, 0 }
  0x34   : > { %p537_p12 = pnand %p535_p6, %p506_p5  ;;  %p543_p10 = scmp.lt.u32.totalorder %s534_s6, %s902_s1 }
  0x36   : > { %p538_p0 = pneg %p537_p12  ;;  %p544_p11 = por %p543_p10, %p541_p9 }
  0x38   : > { %p545_p1 = pnand %p544_p11, %p538_p0 }
  0x3a   : > { %548 = shalt.err (!%p545_p1)
}
  0x3b   : > { %s549_s17 = scalar_lea.vmem %s180_s3, 384  ;;  %s556_s22 = scalar_lea.vmem %s180_s3, 768 }
  0x3c   : > { %p550_p3 = scmp.ne.s32.totalorder %s180_s3, %s549_s17  ;;  %p557_p7 = scmp.lt.s32.totalorder %s180_s3, %s180_s3 }
  0x3d   : > { %p558_p8 = scmp.lt.s32.totalorder %s556_s22, %s549_s17 }
  0x3e   : > { %p552_p4 = pnand %p550_p3, %p506_p5 }
  0x3f   : > { %p559_p6 = por %p558_p8, %p557_p7 }
  0x40   : > { %p553_p13 = pneg %p552_p4 }
  0x42   : > { %p560_p12 = pnand %p559_p6, %p553_p13 }
  0x44   : > { %563 = shalt.err (!%p560_p12)
}
  0x45   : > { %422 = dma.hbm_to_vmem [thread:$0]  (!%p769_p2), %s902_s1, 384, %s180_s3, [#allocation6], %s674_s18, %s674_s18, %s675_s20  }
  0x46   : > { %p912_p0 = scmp.ne.s32.totalorder %s911_s28, 0 }
  0x47   : > { %s193_s4 = sand.u32 (!%p912_p0), 1, %s659_s13   ;;  %p913_p5 = scmp.ne.s32.totalorder (!%p912_p0), %s907_s21, 0 }
  0x48   : > { %191 = sbr.rel (%p912_p0) target bundleno = 110 (0x6e), region = 28  ;;  %s194_s6 = scalar_lea.sflag (!%p912_p0), [#allocation3], %s193_s4 }
  0x49   : > { %s409_s5 = smul.u32 (!%p912_p0), 24, %s193_s4 }
  0x4b   : > { %s197_s7 = scalar_lea.vmem (!%p912_p0), [#allocation2], %s409_s5 }
  0x4f   : > { %629 = dma.done.wait (%p913_p5), %s194_s6, 384  }
  0x50   : > { %631 = vsyncadd (%p913_p5), %s194_s6, 4294966912  ;;  %s203_s27 = scalar_lea.sflag [#allocation6], %s193_s4  ;;  %s206_s8 = scalar_lea.vmem [#allocation5], %s409_s5 }
  0x51   : > { %633 = dma.done.wait (%p913_p5), %s203_s27, 384  }
  0x52   : > { %635 = vsyncadd (%p913_p5), %s203_s27, 4294966912  ;;  %s258_s18 = smul.u32 24, %s663_s14  ;;  %v259_v0 = vlaneseq  ;;  %s229_s20 = sand.u32 1, %s647_s10   ;;  %v245_v8 = vld [vmem:[%s197_s7] sm:$0xff]  ;;  %v246_v9 = vld [vmem:[%s197_s7 + $0x8] sm:$0xff] }
  0x53   : > { %v247_v10 = vld [vmem:[%s197_s7 + $0x10] sm:$0xff]  ;;  %v249_v12 = vld [vmem:[%s206_s8 + $0x8] sm:$0xff]  ;;  %v250_v13 = vld [vmem:[%s206_s8 + $0x10] sm:$0xff]  ;;  %s400_s21 = sshll.u32 %s229_s20, 3  ;;  %s402_s28 = sshll.u32 %s663_s14, 7 }
  0x54   : > { %v260_v1 = vshrl.u32 %v259_v0, 7  ;;  %v263_v2 = vstv %s258_s18  ;;  %v248_v11 = vld [vmem:[%s206_s8] sm:$0xff]  ;;  %v252_v15 = vsub.f32 %v246_v9, %v249_v12  ;;  %v253_v16 = vsub.f32 %v247_v10, %v250_v13  ;;  %s231_s3 = scalar_lea.vmem [#allocation7], %s400_s21  ;;  %s846_s22 = scalar_lea.hbm %s903_s2, %s402_s28 }
  0x55   : > { %v251_v14 = vsub.f32 %v245_v8, %v248_v11  ;;  %s292_s29 = sshll.u32 %s231_s3, 4  ;;  %s279_s23 = scalar_lea.sflag [#allocation4], %s229_s20  ;;  %s848_s29 = int_to_ptr.vmem [resolvable:$true] %s292_s29 }
  0x56   : > { %v261_v3 = vadd.s32 8, %v260_v1  ;;  %v262_v4 = vadd.s32 16, %v260_v1  ;;  %v264_v5 = vadd.s32 %v263_v2, %v260_v1  ;;  %v255_v18 = vand.u32 2147483647, %v252_v15  ;;  %s564_s30 = scalar_lea.vmem %s848_s29, 128  ;;  %p914_p8 = scmp.ne.s32.totalorder %s908_s25, 0 }
  0x57   : > { %v254_v17 = vand.u32 2147483647, %v251_v14  ;;  %v256_v19 = vand.u32 2147483647, %v253_v16  ;;  %p565_p2 = scmp.ne.s32.totalorder %s848_s29, %s564_s30  ;;  %s677_s14 = smov [#allocation7]  }
  0x58   : > { %v265_v6 = vadd.s32 %v263_v2, %v261_v3  ;;  %v266_v7 = vadd.s32 %v263_v2, %v262_v4  ;;  %vm267_vm0 = vcmp.lt.s32.totalorder %v264_v5, 24  ;;  %s568_s4 = sshll.u32 %s677_s14, 4  ;;  %s569_s4 = int_to_ptr.vmem [resolvable:$false] %s568_s4 }
  0x59   : > { %v270_v20 = vsel %vm267_vm0, %v254_v17, 0.0  ;;  %p566_p9 = pnand %p565_p2, %p914_p8  ;;  %s570_s5 = scalar_lea.vmem %s569_s4, 256 }
  0x5a   : > { %vm268_vm1 = vcmp.lt.s32.totalorder %v265_v6, 24  ;;  %vm269_vm2 = vcmp.lt.s32.totalorder %v266_v7, 24  ;;  %p571_p11 = scmp.lt.s32.totalorder %s848_s29, %s569_s4  ;;  %p572_p1 = scmp.lt.s32.totalorder %s570_s5, %s564_s30 }
  0x5b   : > { %v271_v21 = vsel %vm268_vm1, %v255_v18, 0.0  ;;  %v272_v22 = vsel %vm269_vm2, %v256_v19, 0.0  ;;  %p567_p10 = pneg %p566_p9 }
  0x5c   : > { %v273_v23 = vadd.f32 %v271_v21, %v270_v20  ;;  %p573_p3 = por %p572_p1, %p571_p11 }
  0x5e   : > { %v274_v24 = vadd.f32 %v273_v23, %v272_v22  ;;  %p574_p4 = pnand %p573_p3, %p567_p10 }
  0x60   : > { %277 = vst [vmem:[%s231_s3] sm:$0xff] %v274_v24 }
  0x61   : > { %577 = shalt.err (!%p574_p4)
}
  0x62   : > { %s578_s6 = scalar_lea.hbm %s846_s22, 128  ;;  %s582_s8 = scalar_lea.hbm %s903_s2, 256 }
  0x63   : > { %p579_p13 = scmp.ne.s32.totalorder %s846_s22, %s578_s6  ;;  %p583_p12 = scmp.lt.u32.totalorder %s846_s22, %s903_s2 }
  0x64   : > { %p584_p0 = scmp.lt.u32.totalorder %s582_s8, %s578_s6  ;;  %p586_p2 = scmp.lt.u32.totalorder %s578_s6, %s846_s22 }
  0x65   : > { %p580_p7 = pnand %p579_p13, %p914_p8 }
  0x66   : > { %p585_p5 = por %p584_p0, %p583_p12 }
  0x67   : > { %p581_p6 = pneg %p580_p7 }
  0x68   : > { %p587_p9 = por %p586_p2, %p585_p5 }
  0x6a   : > { %p588_p10 = pnand %p587_p9, %p581_p6 }
  0x6c   : > { %591 = shalt.err (!%p588_p10)
}
  0x6d   : > { %414 = dma.vmem_to_hbm [thread:$0]  (%p914_p8), %s848_s29, 128, %s846_s22, %s279_s23  }
  0x6e PF: > { %s304_s21 = sand.u32 1, %s643_s9   ;;  %p915_p11 = scmp.ne.s32.totalorder %s909_s26, 0 }
  0x6f   : > { %p916_p1 = scmp.ge.s32.totalorder %s671_s16, 2  ;;  %s305_s28 = scalar_lea.sflag [#allocation4], %s304_s21 }
  0x71   : > { %p424_p3 = pnand %p916_p1, %p915_p11 }
  0x73   : > { %637 = dma.done.wait (!%p424_p3), %s305_s28, 128  }
  0x74   : > { %639 = vsyncadd (!%p424_p3), %s305_s28, 4294967168  ;;  %s21_s16 = sadd.s32 1, %s671_s16   ;;  %s917_s9 = smov %s647_s10 }
  0x75   : > { %p18_p4 = scmp.ge.s32.totalorder %s21_s16, 4   ;;  %s918_s10 = smov %s651_s11 }
  0x76   : > { %s919_s11 = smov %s751_s24  ;;  %s920_s12 = smov %s659_s13 }
  0x77   : > { %s891_s13 = smov 0   ;;  %s921_s14 = smov %s667_s15 }
  0x78   : > { %s922_s15 = smov %s924_s19  ;;  %20 = sbr.rel (!%p18_p4) target bundleno = 9 (0x9), region = 90 }
  0x7f   :  { %310 = vsyncpa [#allocation3], 1 }
  0x80   :  { %312 = vsyncpa [#allocation3 + $0x1], 1 }
  0x81   :  { %313 = vsyncpa [#allocation6], 1 }
  0x82   :  { %315 = vsyncpa [#allocation6 + $0x1], 1 }
  0x83   :  { %316 = vsyncpa [#allocation4], 1 }
  0x84   :  { %318 = vsyncpa [#allocation4 + $0x1], 1 }

</bundles_post_ra>
